<compile_context>
chip_gen: v7x
topology: tpu7x:2x2x1
jax: 0.10.0
libtpu: 0.0.40
codegen_flags: <defaults>
</compile_context>

<pallas_src>
import functools
import math

import numpy as np
import jax
import jax.numpy as jnp
from jax.experimental import pallas as pl
from jax.experimental.pallas import tpu as pltpu


def _cdiv(a, b):
    return -(-a // b)


def _round_up(a, b):
    return _cdiv(a, b) * b


# ----------------------------- Pallas kernels --------------------------------
def _longrope_half_kernel(pos_ref, invf_ref, cos_ref, sin_ref, *,
                          scaling_factor, half, fold_out):
    """Half-frequency, lane-dense path (128 % head_dim == 0).

    pos_ref : (1, T, 2*fold_out) f32 — 2*fold_out positions per compute row.
              Slots [0, fold_out) feed output rows [0, T); slots
              [fold_out, 2*fold_out) feed output rows [T, 2T).
    invf_ref: (1, 128) f32 — the `half` unique inv-freqs tiled 2*fold_out times.
    cos_ref : (1, 2*T, 128) x.dtype
    sin_ref : (1, 2*T, 128) x.dtype
    """
    nper = 2 * fold_out
    pos = pos_ref[...]                      # (1, T, nper)
    invf = invf_ref[...]                    # (1, 128)
    t = pos.shape[1]

    # posb[0, r, k*half + d] = pos[0, r, k]  (lane broadcast per position slot).
    # Note: if profiling shows this lands on the VALU, move to an XLU (roll-based)
    # construction; at half the rows it is already off the critical path here.
    parts = [jnp.broadcast_to(pos[:, :, k:k + 1], (1, t, half)) for k in range(nper)]
    posb = jnp.concatenate(parts, axis=-1)          # (1, T, 128)

    freqs = posb * invf.reshape(1, 1, nper * half)  # unique half-frequencies only
    c = jnp.cos(freqs)
    s = jnp.sin(freqs)
    if scaling_factor != 1.0:                        # statically skipped when 1.0
        c = c * scaling_factor
        s = s * scaling_factor
    c = c.astype(cos_ref.dtype)
    s = s.astype(sin_ref.dtype)

    def expand(arr, base):
        # [h_k] (half lanes) -> [h_k, h_k] (head_dim lanes) for each position slot:
        # the cat(freqs, freqs) duplication, done with static lane slices.
        chunks = []
        for k in range(fold_out):
            h = arr[:, :, (base + k) * half:(base + k + 1) * half]
            chunks.append(h)
            chunks.append(h)
        return jnp.concatenate(chunks, axis=-1)      # (1, T, 128)

    # Top half of the output tile (rows [0, T)) <- slots [0, fold_out);
    # bottom half (rows [T, 2T)) <- slots [fold_out, 2*fold_out).
    cos_ref[:, 0:t, :] = expand(c, 0)
    sin_ref[:, 0:t, :] = expand(s, 0)
    cos_ref[:, t:2 * t, :] = expand(c, fold_out)
    sin_ref[:, t:2 * t, :] = expand(s, fold_out)


def _longrope_simple_kernel(pos_ref, invf_ref, cos_ref, sin_ref, *, scaling_factor):
    """Generic fallback (head_dim does not divide 128, e.g. 96)."""
    freqs = pos_ref[...] * invf_ref[...].reshape(1, 1, -1)   # (1,T,1)*(1,1,D)
    c = jnp.cos(freqs)
    s = jnp.sin(freqs)
    if scaling_factor != 1.0:
        c = c * scaling_factor
        s = s * scaling_factor
    cos_ref[...] = c.astype(cos_ref.dtype)
    sin_ref[...] = s.astype(sin_ref.dtype)


# ------------------------------- Wrapper -------------------------------------
def longrope_scaled_rotary_embedding(
    x,
    position_ids,
    *,
    head_dim,
    base=10000.0,
    max_position_embeddings=256,
    original_max_position_embeddings=64,
    short_factor=None,
    long_factor=None,
    seq_tile=1024,
):
    """Returns (cos, sin), each (B, S, head_dim), dtype = x.dtype."""
    assert head_dim % 2 == 0
    half = head_dim // 2
    B, S = position_ids.shape

    # --- glue: data-dependent factor pick + rescaled inverse frequencies ------
    if short_factor is None:
        short_factor = jnp.ones((half,), jnp.float32)
    if long_factor is None:
        long_factor = jnp.ones((half,), jnp.float32)
    seq_len = jnp.max(position_ids) + 1
    exponents = jnp.arange(0, head_dim, 2, dtype=jnp.float32) / float(head_dim)
    ext_factors = jnp.where(
        seq_len > original_max_position_embeddings,
        jnp.asarray(long_factor, jnp.float32),
        jnp.asarray(short_factor, jnp.float32),
    )
    inv_freq_half = 1.0 / (ext_factors * (base ** exponents))      # (half,) f32

    # --- static attention scaling factor ---------------------------------------
    scale = max_position_embeddings / original_max_position_embeddings
    if scale <= 1.0:
        scaling_factor = 1.0
    else:
        scaling_factor = math.sqrt(
            1.0 + math.log(scale) / math.log(original_max_position_embeddings))

    # --- batch dedup: identical position rows -> compute once ------------------
    dedup = (B == 1)
    if not dedup:
        try:
            pid_np = np.asarray(position_ids)      # raises under jit tracing
            dedup = bool((pid_np == pid_np[:1]).all())
        except Exception:
            dedup = False
    pos = position_ids[:1] if dedup else position_ids
    b_eff = pos.shape[0]
    pos_f32 = pos.astype(jnp.float32)  # exact for positions < 2**24

    fast = head_dim <= 128 and 128 % head_dim == 0
    if fast:
        # ---- half-frequency, lane-dense path ----------------------------------
        fold_out = 128 // head_dim           # output positions per 128-lane row
        nper = 2 * fold_out                  # compute positions per 128-lane row
        r_c_total = _cdiv(S, nper)           # compute rows needed
        # Cap the tile (bounded VMEM) but aim for >= 4 grid steps when S allows.
        tile_c = min(seq_tile, _round_up(max(_cdiv(r_c_total, 4), 8), 8))
        n_t = _cdiv(r_c_total, tile_c)
        s_pad = n_t * tile_c * nper
        if s_pad != S:
            pos_f32 = jnp.pad(pos_f32, ((0, 0), (0, s_pad - S)))

        # Arrange positions so compute row r of tile t carries:
        #   slots [0, fold_out)            -> output rows  t*2T + r
        #   slots [fold_out, 2*fold_out)   -> output rows  t*2T + T + r
        pos_c = pos_f32.reshape(b_eff, n_t, 2, tile_c, fold_out)
        pos_c = pos_c.transpose(0, 1, 3, 2, 4).reshape(b_eff, n_t * tile_c, nper)
        invf_lane = jnp.tile(inv_freq_half, (nper,)).reshape(1, 128)

        kernel = functools.partial(_longrope_half_kernel,
                                   scaling_factor=scaling_factor,
                                   half=half, fold_out=fold_out)
        r_out = n_t * 2 * tile_c
        out_shape = (jax.ShapeDtypeStruct((b_eff, r_out, 128), x.dtype),
                     jax.ShapeDtypeStruct((b_eff, r_out, 128), x.dtype))
        cos_f, sin_f = pl.pallas_call(
            kernel,
            out_shape=out_shape,
            grid=(b_eff, n_t),
            in_specs=[
                pl.BlockSpec((1, tile_c, nper), lambda b, t: (b, t, 0)),
                pl.BlockSpec((1, 128), lambda b, t: (0, 0)),
            ],
            out_specs=(
                pl.BlockSpec((1, 2 * tile_c, 128), lambda b, t: (b, t, 0)),
                pl.BlockSpec((1, 2 * tile_c, 128), lambda b, t: (b, t, 0)),
            ),
            compiler_params=pltpu.CompilerParams(
                dimension_semantics=("parallel", "parallel"),
                vmem_limit_bytes=32 << 20,
            ),
        )(pos_c, invf_lane)
        # Folded layout is the same contiguous bytes as (b_eff, s_pad, head_dim).
        cos = cos_f.reshape(b_eff, s_pad, head_dim)[:, :S, :]
        sin = sin_f.reshape(b_eff, s_pad, head_dim)[:, :S, :]
    else:
        # ---- generic path (head_dim not a divisor of 128, e.g. 96) ------------
        tile_r = min(seq_tile, _round_up(max(_cdiv(S, 4), 8), 8))
        n_t = _cdiv(S, tile_r)
        s_pad = n_t * tile_r
        if s_pad != S:
            pos_f32 = jnp.pad(pos_f32, ((0, 0), (0, s_pad - S)))
        pos_in = pos_f32.reshape(b_eff, s_pad, 1)
        invf_full = jnp.concatenate([inv_freq_half, inv_freq_half]).reshape(1, head_dim)

        kernel = functools.partial(_longrope_simple_kernel,
                                   scaling_factor=scaling_factor)
        out_shape = (jax.ShapeDtypeStruct((b_eff, s_pad, head_dim), x.dtype),
                     jax.ShapeDtypeStruct((b_eff, s_pad, head_dim), x.dtype))
        cos_f, sin_f = pl.pallas_call(
            kernel,
            out_shape=out_shape,
            grid=(b_eff, n_t),
            in_specs=[
                pl.BlockSpec((1, tile_r, 1), lambda b, t: (b, t, 0)),
                pl.BlockSpec((1, head_dim), lambda b, t: (0, 0)),
            ],
            out_specs=(
                pl.BlockSpec((1, tile_r, head_dim), lambda b, t: (b, t, 0)),
                pl.BlockSpec((1, tile_r, head_dim), lambda b, t: (b, t, 0)),
            ),
            compiler_params=pltpu.CompilerParams(
                dimension_semantics=("parallel", "parallel"),
                vmem_limit_bytes=32 << 20,
            ),
        )(pos_in, invf_full)
        cos = cos_f[:, :S, :]
        sin = sin_f[:, :S, :]

    if dedup and B > 1:
        cos = jnp.broadcast_to(cos, (B, S, head_dim))
        sin = jnp.broadcast_to(sin, (B, S, head_dim))
    return cos, sin


# -------------------------- Pure-JAX reference --------------------------------
def _reference(x, position_ids, *, head_dim, base, max_pos, orig_max_pos,
               short_factor, long_factor):
    seq_len = jnp.max(position_ids) + 1
    exponents = jnp.arange(0, head_dim, 2, dtype=jnp.float32) / float(head_dim)
    ext = jnp.where(seq_len > orig_max_pos, long_factor, short_factor)
    inv_freq = 1.0 / (ext * (base ** exponents))
    freqs = position_ids.astype(jnp.float32)[:, :, None] * inv_freq[None, None, :]
    emb = jnp.concatenate([freqs, freqs], axis=-1)
    scale = max_pos / orig_max_pos
    sf = 1.0 if scale <= 1.0 else math.sqrt(1.0 + math.log(scale) / math.log(orig_max_pos))
    return (jnp.cos(emb) * sf).astype(x.dtype), (jnp.sin(emb) * sf).astype(x.dtype)


if __name__ == "__main__":
    key = jax.random.PRNGKey(0)

    # Small, module-consistent shapes.
    batch, num_heads, seq, head_dim = 2, 4, 8, 64
    half = head_dim // 2
    base = 10000.0
    max_position_embeddings = 256
    original_max_position_embeddings = 64

    k_x, k_s, k_l = jax.random.split(key, 3)
    # x is only consumed for dtype / shape (as in the torch module).
    x = jax.random.normal(k_x, (batch, num_heads, seq, head_dim), dtype=jnp.float32)

    # Deterministic synthetic rope_scaling factors (>= 1.0), per LongRoPE config.
    short_factor = 1.0 + 0.05 * jnp.arange(half, dtype=jnp.float32)
    long_factor = 1.0 + 0.25 * jnp.arange(half, dtype=jnp.float32)

    # Position ids derived from x's sequence length (stub forward only takes x).
    position_ids = jnp.broadcast_to(jnp.arange(seq, dtype=jnp.int32), (batch, seq))

    cos, sin = longrope_scaled_rotary_embedding(
        x,
        position_ids,
        head_dim=head_dim,
        base=base,
        max_position_embeddings=max_position_embeddings,
        original_max_position_embeddings=original_max_position_embeddings,
        short_factor=short_factor,
        long_factor=long_factor,
    )
    cos = jax.block_until_ready(cos)
    sin = jax.block_until_ready(sin)

    cos_ref, sin_ref = _reference(
        x, position_ids, head_dim=head_dim, base=base,
        max_pos=max_position_embeddings,
        orig_max_pos=original_max_position_embeddings,
        short_factor=short_factor, long_factor=long_factor,
    )

    assert cos.shape == (batch, seq, head_dim) and sin.shape == (batch, seq, head_dim)
    assert cos.dtype == x.dtype and sin.dtype == x.dtype
    assert jnp.allclose(cos, cos_ref, atol=1e-5, rtol=1e-5)
    assert jnp.allclose(sin, sin_ref, atol=1e-5, rtol=1e-5)

    print("KERNEL_OK")
</pallas_src>

<mosaic_0001>
module attributes {stable_mosaic.version = 11 : i64} {
  func.func @_longrope_half_kernel(%arg0: i32, %arg1: i32, %arg2: memref<1x8x4xf32, #tpu.memory_space<vmem>>, %arg3: memref<1x128xf32, #tpu.memory_space<vmem>>, %arg4: memref<1x16x128xf32, #tpu.memory_space<vmem>>, %arg5: memref<1x16x128xf32, #tpu.memory_space<vmem>>) attributes {dimension_semantics = [#tpu.dimension_semantics<parallel>, #tpu.dimension_semantics<parallel>], iteration_bounds = array<i64: 1, 1>, scalar_prefetch = 0 : i64, scratch_operands = 0 : i64, tpu.core_type = #tpu.core_type<tc>, window_params = [{transform_indices = @transform_0, window_bounds = array<i64: 1, 8, 4>}, {pipeline_mode = #tpu.pipeline_mode<synchronous>, transform_indices = @transform_1, window_bounds = array<i64: 1, 128>}, {transform_indices = @transform_2, window_bounds = array<i64: 1, 16, 128>}, {transform_indices = @transform_3, window_bounds = array<i64: 1, 16, 128>}]} {
    %c0 = arith.constant 0 : index
    %c0_0 = arith.constant 0 : index
    %c0_1 = arith.constant 0 : index
    %0 = vector.load %arg2[%c0, %c0_0, %c0_1] : memref<1x8x4xf32, #tpu.memory_space<vmem>>, vector<1x8x4xf32>
    %c0_2 = arith.constant 0 : index
    %c0_3 = arith.constant 0 : index
    %1 = vector.load %arg3[%c0_2, %c0_3] : memref<1x128xf32, #tpu.memory_space<vmem>>, vector<1x128xf32>
    %2 = vector.extract_strided_slice %0 {offsets = [0, 0, 0], sizes = [1, 8, 1], strides = [1, 1, 1]} : vector<1x8x4xf32> to vector<1x8x1xf32>
    %3 = vector.shape_cast %2 : vector<1x8x1xf32> to vector<1x8x1xf32>
    %4 = vector.broadcast %3 : vector<1x8x1xf32> to vector<1x8x32xf32>
    %5 = vector.extract_strided_slice %0 {offsets = [0, 0, 1], sizes = [1, 8, 1], strides = [1, 1, 1]} : vector<1x8x4xf32> to vector<1x8x1xf32>
    %6 = vector.shape_cast %5 : vector<1x8x1xf32> to vector<1x8x1xf32>
    %7 = vector.broadcast %6 : vector<1x8x1xf32> to vector<1x8x32xf32>
    %8 = vector.extract_strided_slice %0 {offsets = [0, 0, 2], sizes = [1, 8, 1], strides = [1, 1, 1]} : vector<1x8x4xf32> to vector<1x8x1xf32>
    %9 = vector.shape_cast %8 : vector<1x8x1xf32> to vector<1x8x1xf32>
    %10 = vector.broadcast %9 : vector<1x8x1xf32> to vector<1x8x32xf32>
    %11 = vector.extract_strided_slice %0 {offsets = [0, 0, 3], sizes = [1, 8, 1], strides = [1, 1, 1]} : vector<1x8x4xf32> to vector<1x8x1xf32>
    %12 = vector.shape_cast %11 : vector<1x8x1xf32> to vector<1x8x1xf32>
    %13 = vector.broadcast %12 : vector<1x8x1xf32> to vector<1x8x32xf32>
    %14 = tpu.concatenate %4, %7, %10, %13 in 2 : vector<1x8x32xf32>, vector<1x8x32xf32>, vector<1x8x32xf32>, vector<1x8x32xf32> -> vector<1x8x128xf32>
    %15 = vector.shape_cast %1 : vector<1x128xf32> to vector<1x1x128xf32>
    %16 = vector.broadcast %15 : vector<1x1x128xf32> to vector<1x8x128xf32>
    %17 = arith.mulf %14, %16 : vector<1x8x128xf32>
    %18 = math.cos %17 : vector<1x8x128xf32>
    %19 = math.sin %17 : vector<1x8x128xf32>
    %cst = arith.constant 1.15470052 : f32
    %20 = vector.broadcast %cst : f32 to vector<1x8x128xf32>
    %21 = arith.mulf %18, %20 : vector<1x8x128xf32>
    %cst_4 = arith.constant 1.15470052 : f32
    %22 = vector.broadcast %cst_4 : f32 to vector<1x8x128xf32>
    %23 = arith.mulf %19, %22 : vector<1x8x128xf32>
    %24 = vector.extract_strided_slice %21 {offsets = [0, 0, 0], sizes = [1, 8, 32], strides = [1, 1, 1]} : vector<1x8x128xf32> to vector<1x8x32xf32>
    %25 = vector.extract_strided_slice %21 {offsets = [0, 0, 32], sizes = [1, 8, 32], strides = [1, 1, 1]} : vector<1x8x128xf32> to vector<1x8x32xf32>
    %26 = tpu.concatenate %24, %24, %25, %25 in 2 : vector<1x8x32xf32>, vector<1x8x32xf32>, vector<1x8x32xf32>, vector<1x8x32xf32> -> vector<1x8x128xf32>
    %c0_5 = arith.constant 0 : index
    %c0_6 = arith.constant 0 : index
    %c0_7 = arith.constant 0 : index
    %27 = vector.load %arg4[%c0_5, %c0_6, %c0_7] : memref<1x16x128xf32, #tpu.memory_space<vmem>>, vector<1x8x128xf32>
    tpu.vector_store %arg4[%c0_5, %c0_6, %c0_7], %26 {strides = array<i32>} : memref<1x16x128xf32, #tpu.memory_space<vmem>>, vector<1x8x128xf32>,
    %28 = vector.extract_strided_slice %23 {offsets = [0, 0, 0], sizes = [1, 8, 32], strides = [1, 1, 1]} : vector<1x8x128xf32> to vector<1x8x32xf32>
    %29 = vector.extract_strided_slice %23 {offsets = [0, 0, 32], sizes = [1, 8, 32], strides = [1, 1, 1]} : vector<1x8x128xf32> to vector<1x8x32xf32>
    %30 = tpu.concatenate %28, %28, %29, %29 in 2 : vector<1x8x32xf32>, vector<1x8x32xf32>, vector<1x8x32xf32>, vector<1x8x32xf32> -> vector<1x8x128xf32>
    %c0_8 = arith.constant 0 : index
    %c0_9 = arith.constant 0 : index
    %c0_10 = arith.constant 0 : index
    %31 = vector.load %arg5[%c0_8, %c0_9, %c0_10] : memref<1x16x128xf32, #tpu.memory_space<vmem>>, vector<1x8x128xf32>
    tpu.vector_store %arg5[%c0_8, %c0_9, %c0_10], %30 {strides = array<i32>} : memref<1x16x128xf32, #tpu.memory_space<vmem>>, vector<1x8x128xf32>,
    %32 = vector.extract_strided_slice %21 {offsets = [0, 0, 64], sizes = [1, 8, 32], strides = [1, 1, 1]} : vector<1x8x128xf32> to vector<1x8x32xf32>
    %33 = vector.extract_strided_slice %21 {offsets = [0, 0, 96], sizes = [1, 8, 32], strides = [1, 1, 1]} : vector<1x8x128xf32> to vector<1x8x32xf32>
    %34 = tpu.concatenate %32, %32, %33, %33 in 2 : vector<1x8x32xf32>, vector<1x8x32xf32>, vector<1x8x32xf32>, vector<1x8x32xf32> -> vector<1x8x128xf32>
    %c0_11 = arith.constant 0 : index
    %c8 = arith.constant 8 : index
    %c0_12 = arith.constant 0 : index
    %35 = vector.load %arg4[%c0_11, %c8, %c0_12] : memref<1x16x128xf32, #tpu.memory_space<vmem>>, vector<1x8x128xf32>
    tpu.vector_store %arg4[%c0_11, %c8, %c0_12], %34 {strides = array<i32>} : memref<1x16x128xf32, #tpu.memory_space<vmem>>, vector<1x8x128xf32>,
    %36 = vector.extract_strided_slice %23 {offsets = [0, 0, 64], sizes = [1, 8, 32], strides = [1, 1, 1]} : vector<1x8x128xf32> to vector<1x8x32xf32>
    %37 = vector.extract_strided_slice %23 {offsets = [0, 0, 96], sizes = [1, 8, 32], strides = [1, 1, 1]} : vector<1x8x128xf32> to vector<1x8x32xf32>
    %38 = tpu.concatenate %36, %36, %37, %37 in 2 : vector<1x8x32xf32>, vector<1x8x32xf32>, vector<1x8x32xf32>, vector<1x8x32xf32> -> vector<1x8x128xf32>
    %c0_13 = arith.constant 0 : index
    %c8_14 = arith.constant 8 : index
    %c0_15 = arith.constant 0 : index
    %39 = vector.load %arg5[%c0_13, %c8_14, %c0_15] : memref<1x16x128xf32, #tpu.memory_space<vmem>>, vector<1x8x128xf32>
    tpu.vector_store %arg5[%c0_13, %c8_14, %c0_15], %38 {strides = array<i32>} : memref<1x16x128xf32, #tpu.memory_space<vmem>>, vector<1x8x128xf32>,
    return
  }
  func.func @transform_0(%arg0: i32, %arg1: i32) -> (i32, i32, i32) {
    %c0_i32 = arith.constant 0 : i32
    %c0_i32_0 = arith.constant 0 : i32
    return %arg0, %arg1, %c0_i32 : i32, i32, i32
  }
  func.func @transform_1(%arg0: i32, %arg1: i32) -> (i32, i32) {
    %c0_i32 = arith.constant 0 : i32
    %c0_i32_0 = arith.constant 0 : i32
    %c0_i32_1 = arith.constant 0 : i32
    return %c0_i32, %c0_i32_0 : i32, i32
  }
  func.func @transform_2(%arg0: i32, %arg1: i32) -> (i32, i32, i32) {
    %c0_i32 = arith.constant 0 : i32
    %c0_i32_0 = arith.constant 0 : i32
    return %arg0, %arg1, %c0_i32 : i32, i32, i32
  }
  func.func @transform_3(%arg0: i32, %arg1: i32) -> (i32, i32, i32) {
    %c0_i32 = arith.constant 0 : i32
    %c0_i32_0 = arith.constant 0 : i32
    return %arg0, %arg1, %c0_i32 : i32, i32, i32
  }
}

</mosaic_0001>

<bundles_post_ra>
// kernel: tpu_custom_call.1
= control target key start
LH: loop header
LB: loop body
LE: loop exit
PB: predicated region body
PF: predicated region fallthrough
CT: control target
= control target key end

     0   :  { %9 = vsyncpa [#allocation3], 0  ;;  %v411_v1 = vmov 0   ;;  %v412_v2 = vmov 2   ;;  %s521_s0 = inlined_call_operand.vmem [shape: f32[1,8,4], index: 0, kind: input, shape index: {}]   ;;  %s522_s1 = inlined_call_operand.vmem [shape: f32[1,128], index: 1, kind: input, shape index: {}]   ;;  %s523_s2 = inlined_call_operand.hbm [shape: f32[1,16,128], index: 2, kind: output, shape index: {0}]   ;;  %s524_s3 = inlined_call_operand.hbm [shape: f32[1,16,128], index: 3, kind: output, shape index: {1}]  }
   0x1   :  { %v15_v0 = vld [vmem:[%s521_s0] sm:$0xff]  ;;  %354 = vset.pattern.permute.xlu0 %v411_v1  ;;  %356 = vset.pattern.permute.xlu1 %v412_v2 }
   0x2   :  { %10 = vsyncpa [#allocation5], 0  ;;  %19 = vperm.xlu0 %354, %v15_v0   ;;  %27 = vperm.xlu1 %356, %v15_v0   ;;  %v413_v3 = vmov 1   ;;  %v414_v4 = vmov 3   ;;  %vm34_vm0 = vcmask 261120   ;;  %vm36_vm1 = vcmask 523264  }
   0x3   :  { %vm38_vm2 = vcmask 785408   ;;  %v324_v10 = vld [vmem:[%s522_s1] ss:$0 sm:$0xff]  ;;  %v415_v24 = vmov 683565275   ;;  %s421_s1 = smov 64  }
   0x4   :  { %v416_v26 = vmov 2475754826   ;;  %v417_v29 = vmov 2131351028   ;;  %v418_v32 = vmov 2102212464  }
   0x5   :  { %v419_v35 = vmov 920167782   ;;  %v420_v38 = vmov 1326507024   ;;  %s422_s15 = smov 32   ;;  %s423_s16 = smov 96  }
   0x6   :  { %355 = vset.pattern.permute.xlu0 %v413_v3  ;;  %357 = vset.pattern.permute.xlu1 %v414_v4  ;;  %s424_s17 = smov [#allocation2]   ;;  %s425_s19 = smov [#allocation4]  }
   0x7   :  { %23 = vperm.xlu0 %355, %v15_v0   ;;  %31 = vperm.xlu1 %357, %v15_v0   ;;  %s297_s18 = sshll.u32 %s424_s17, 4  ;;  %s309_s20 = sshll.u32 %s425_s19, 4  ;;  %s298_s18 = int_to_ptr.vmem [resolvable:$true] %s297_s18  ;;  %s490_s20 = int_to_ptr.vmem [resolvable:$true] %s309_s20 }
   0x8   :  { %s363_s21 = scalar_lea.vmem %s298_s18, 256  ;;  %p368_p1 = scmp.lt.s32.totalorder %s298_s18, %s298_s18 }
   0x9   :  { %p364_p0 = scmp.ne.s32.totalorder %s298_s18, %s363_s21  ;;  %p369_p2 = scmp.lt.s32.totalorder %s363_s21, %s363_s21 }
   0xb   :  { %358 = vset.pattern.permute.xlu0 %v414_v4  ;;  %p370_p3 = por %p369_p2, %p368_p1 }
   0xd   :  { %p371_p4 = pnand %p370_p3, %p364_p0 }
  0x81   :  { %v20_v5 = vpop.permute.xlu0 %19  ;;  %v28_v6 = vpop.permute.xlu1 %27 }
  0x86   :  { %v24_v7 = vpop.permute.xlu0 %23  ;;  %v32_v8 = vpop.permute.xlu1 %31 }
  0x87   :  { %v35_v9 = vsel %vm34_vm0, %v20_v5, %v24_v7 }
  0x88   :  { %v37_v11 = vsel %vm36_vm1, %v35_v9, %v28_v6 }
  0x89   :  { %v39_v12 = vsel %vm38_vm2, %v37_v11, %v32_v8 }
  0x8a   :  { %v457_v13 = vmul.f32 %v324_v10, %v39_v12 }
  0x8c   :  { %v50_v14 = vand.u32 2139095040, %v457_v13  ;;  %v47_v18 = vand.u32 2147483647, %v457_v13  ;;  %vm49_vm10 = vcmp.lt.s32.totalorder %v457_v13, 0 }
  0x8e   :  { %v51_v15 = vshrl.u32 %v50_v14, 23  ;;  %v54_v21 = vand.u32 8388607, %v47_v18  ;;  %vm48_vm11 = vcmp.le.f32.partialorder %v47_v18, 0.7853982 }
  0x90   :  { %v325_v16 = vadd.s32 4294967169, %v51_v15  ;;  %v55_v40 = vor.u32 8388608, %v54_v21 }
  0x92   :  { %v57_v17 = vadd.s32 1, %v325_v16  ;;  %v95_v54 = vshll.u32 %v55_v40, 8 }
  0x94   :  { %vm58_vm3 = vcmp.gt.s32.totalorder %v57_v17, 0 }
  0x95   :  { %v59_v19 = vsel %vm58_vm3, %v57_v17, 0 }
  0x96   :  { %v61_v20 = vand.u32 31, %v59_v19  ;;  %v60_v23 = vshrl.u32 %v59_v19, 5 }
  0x98   :  { %v62_v22 = vsub.s32 32, %v61_v20  ;;  %v64_v25 = vshll.u32 %v415_v24, %v61_v20  ;;  %v67_v27 = vshll.u32 %v416_v26, %v61_v20  ;;  %v70_v31 = vshll.u32 %v417_v29, %v61_v20 }
  0x99   :  { %v73_v34 = vshll.u32 %v418_v32, %v61_v20  ;;  %v76_v37 = vshll.u32 %v419_v35, %v61_v20  ;;  %vm79_vm4 = vcmp.lt.s32.totalorder %v60_v23, 1  ;;  %vm82_vm5 = vcmp.lt.s32.totalorder %v60_v23, 4 }
  0x9a   :  { %v65_v28 = vshrl.u32 %v416_v26, %v62_v22  ;;  %v68_v30 = vshrl.u32 %v417_v29, %v62_v22  ;;  %v71_v33 = vshrl.u32 %v418_v32, %v62_v22  ;;  %v74_v36 = vshrl.u32 %v419_v35, %v62_v22 }
  0x9b   :  { %v77_v39 = vshrl.u32 %v420_v38, %v62_v22  ;;  %v63_v49 = vshrl.u32 %v415_v24, %v62_v22  ;;  %vm81_vm6 = vcmp.lt.s32.totalorder %v60_v23, 3  ;;  %vm80_vm7 = vcmp.lt.s32.totalorder %v60_v23, 2 }
  0x9c   :  { %v66_v41 = vor.u32 %v65_v28, %v64_v25  ;;  %v69_v42 = vor.u32 %v68_v30, %v67_v27  ;;  %v72_v43 = vor.u32 %v71_v33, %v70_v31  ;;  %v75_v44 = vor.u32 %v74_v36, %v73_v34 }
  0x9d   :  { %v78_v45 = vor.u32 %v77_v39, %v76_v37 }
  0x9e   :  { %v84_v46 = vsel %vm82_vm5, %v72_v43, 2102212464  ;;  %v87_v47 = vsel %vm79_vm4, %v66_v41, %v69_v42  ;;  %v91_v48 = vsel %vm79_vm4, %v69_v42, %v72_v43  ;;  %v88_v50 = vsel %vm82_vm5, %v75_v44, 920167782 }
  0x9f   :  { %v92_v51 = vsel %vm82_vm5, %v78_v45, 1326507024  ;;  %v89_v52 = vsel %vm81_vm6, %v72_v43, %v88_v50  ;;  %v83_v55 = vsel %vm79_vm4, %v63_v49, %v66_v41  ;;  %v85_v56 = vsel %vm81_vm6, %v69_v42, %v84_v46 }
  0xa0   :  { %v93_v53 = vsel %vm81_vm6, %v75_v44, %v92_v51  ;;  %v90_v57 = vsel %vm80_vm7, %v87_v47, %v89_v52  ;;  %v86_v63 = vsel %vm80_vm7, %v83_v55, %v85_v56  ;;  %vm139_vm5 = vweird.f32 %v457_v13 }
  0xa1   :  { %v94_v58 = vsel %vm80_vm7, %v91_v48, %v93_v53  ;;  %v466_v61 = vmul.u32.u64.low %v95_v54, %v90_v57  ;;  %v467_v62 = vmul.u32.u64.high %v95_v54, %v90_v57, %v466_v61  ;;  %v102_v1 = vmul.u32 %v95_v54, %v86_v63 }
  0xa2   :  { %v463_v59 = vmul.u32.u64.low %v95_v54, %v94_v58  ;;  %v464_v60 = vmul.u32.u64.high %v95_v54, %v94_v58, %v463_v59 }
  0xa3   :  { %v105_v0 = vadd.s32 1, %v467_v62 }
  0xa4   :  { %vm104_vm8 = vc.u32 %v464_v60, %v466_v61  ;;  %v103_v14 = vadd.s32 %v466_v61, %v464_v60 }
  0xa5   :  { %v106_v2 = vsel %vm104_vm8, %v105_v0, %v467_v62 }
  0xa6   :  { %v107_v3 = vadd.s32 %v106_v2, %v102_v1 }
  0xa8   :  { %v108_v4 = vadd.s32 536870912, %v107_v3 }
  0xaa   :  { %v109_v5 = vshrl.u32 %v108_v4, 30 }
  0xac   :  { %v110_v6 = vshll.u32 %v109_v5, 30  ;;  %v133_v27 = vsub.s32 4, %v109_v5 }
  0xae   :  { %v111_v7 = vsub.s32 %v107_v3, %v110_v6  ;;  %v134_v30 = vsel %vm49_vm10, %v133_v27, %v109_v5 }
  0xaf   :  { %v136_v32 = vsel %vm48_vm11, 0, %v134_v30 }
  0xb0   :  { %v113_v8 = vsub.s32 0, %v111_v7  ;;  %v243_v33 = vadd.s32 3, %v136_v32  ;;  %v140_v34 = vand.u32 3, %v136_v32 }
  0xb2   :  { %v326_v9 = vmin.u32 %v113_v8, %v111_v7  ;;  %v244_v35 = vand.u32 3, %v243_v33  ;;  %vm145_vm12 = vcmp.eq.s32.totalorder %v140_v34, 2  ;;  %vm142_vm14 = vcmp.eq.s32.totalorder %v140_v34, 0 }
  0xb3   :  { %vm141_vm3 = vcmp.lt.s32.totalorder %v140_v34, 2 }
  0xb4   :  { %v115_v10 = vclz %v326_v9  ;;  %vm249_vm13 = vcmp.eq.s32.totalorder %v244_v35, 2  ;;  %vm246_vm15 = vcmp.eq.s32.totalorder %v244_v35, 0  ;;  %vm245_vm4 = vcmp.lt.s32.totalorder %v244_v35, 2 }
  0xb6   :  { %v327_v11 = vadd.s32 4294967294, %v115_v10 }
  0xb8   :  { %vm328_vm9 = vcmp.lt.s32.totalorder %v327_v11, 0 }
  0xb9   :  { %v118_v12 = vsel %vm328_vm9, 0, %v327_v11 }
  0xba   :  { %v119_v15 = vsub.s32 32, %v118_v12  ;;  %v123_v16 = vsub.s32 4294967266, %v118_v12  ;;  %v120_v17 = vshll.u32 %v111_v7, %v118_v12 }
  0xbc   :  { %v121_v19 = vshrl.u32 %v103_v14, %v119_v15  ;;  %v124_v20 = vadd.s32 127, %v123_v16 }
  0xbe   :  { %v122_v21 = vor.u32 %v121_v19, %v120_v17  ;;  %v125_v22 = vshll.u32 %v124_v20, 23 }
  0xc0   :  { %v126_v23 = vor.u32 4788187, %v125_v22  ;;  %v129_v25 = vcvt.s32.f32 %v122_v21 }
  0xc2   :  { %v127_v24 = vand.u32 2147483647, %v126_v23 }
  0xc4   :  { %v130_v26 = vmul.f32 %v129_v25, %v127_v24 }
  0xc6   :  { %v131_v28 = vxor.u32 2147483648, %v130_v26 }
  0xc8   :  { %v132_v29 = vsel %vm49_vm10, %v131_v28, %v130_v26 }
  0xc9   :  { %v135_v31 = vsel %vm48_vm11, %v457_v13, %v132_v29 }
  0xca   :  { %359 = vcosq.f32 %v135_v31 }
  0xcb   :  { %361 = vsinq.f32 %v135_v31 }
  0xd4   :  { %v360_v36 = vpop.eup %359 }
  0xd5   :  { %v362_v37 = vpop.eup %361  ;;  %v146_v38 = vxor.u32 2147483648, %v360_v36 }
  0xd6   :  { %v143_v39 = vxor.u32 2147483648, %v362_v37 }
  0xd7   :  { %v147_v40 = vsel %vm145_vm12, %v146_v38, %v362_v37  ;;  %v251_v18 = vsel %vm249_vm13, %v146_v38, %v362_v37 }
  0xd8   :  { %v144_v41 = vsel %vm142_vm14, %v360_v36, %v143_v39  ;;  %v248_v42 = vsel %vm246_vm15, %v360_v36, %v143_v39 }
  0xd9   :  { %v148_v43 = vsel %vm141_vm3, %v144_v41, %v147_v40  ;;  %v252_v44 = vsel %vm245_vm4, %v248_v42, %v251_v18 }
  0xda   :  { %v149_v45 = vsel %vm139_vm5, nan, %v148_v43  ;;  %v253_v47 = vsel %vm139_vm5, nan, %v252_v44 }
  0xdb   :  { %v254_v46 = vmul.f32 1.1547005, %v149_v45  ;;  %v255_v48 = vmul.f32 1.1547005, %v253_v47 }
  0xdd   :  { %260 = vrot.lane.b32.xlu0 %v254_v46, %s421_s1  ;;  %257 = vrot.lane.b32.xlu1 %v254_v46, %s422_s15 }
  0xe1   :  { %271 = vrot.lane.b32.xlu0 %v255_v48, %s421_s1  ;;  %268 = vrot.lane.b32.xlu1 %v255_v48, %s422_s15 }
  0xe5   :  { %285 = vrot.lane.b32.xlu0 %v255_v48, %s423_s16  ;;  %278 = vrot.lane.b32.xlu1 %v254_v46, %s423_s16 }
 0x14f   :  { %v261_v49 = vpop.permute.xlu0 %260  ;;  %v258_v50 = vpop.permute.xlu1 %257 }
 0x150   :  { %v263_v51 = vsel %vm34_vm0, %v254_v46, %v258_v50 }
 0x151   :  { %v264_v13 = vsel %vm36_vm1, %v263_v51, %v258_v50 }
 0x152   :  { %v265_v52 = vsel %vm38_vm2, %v264_v13, %v261_v49 }
 0x153   :  { %266 = vst [vmem:[#allocation2] sm:$0xff] %v265_v52  ;;  %v272_v53 = vpop.permute.xlu0 %271  ;;  %v269_v54 = vpop.permute.xlu1 %268 }
 0x154   :  { %v274_v55 = vsel %vm34_vm0, %v255_v48, %v269_v54 }
 0x155   :  { %v275_v56 = vsel %vm36_vm1, %v274_v55, %v269_v54 }
 0x156   :  { %v276_v57 = vsel %vm38_vm2, %v275_v56, %v272_v53 }
 0x157   :  { %277 = vst [vmem:[#allocation4] sm:$0xff] %v276_v57  ;;  %v286_v58 = vpop.permute.xlu0 %285  ;;  %v279_v59 = vpop.permute.xlu1 %278 }
 0x158   :  { %v288_v60 = vsel %vm34_vm0, %v272_v53, %v286_v58  ;;  %v281_v61 = vsel %vm34_vm0, %v261_v49, %v279_v59 }
 0x159   :  { %v289_v62 = vsel %vm36_vm1, %v288_v60, %v286_v58  ;;  %v282_v63 = vsel %vm36_vm1, %v281_v61, %v279_v59 }
 0x15a   :  { %v290_v0 = vsel %vm38_vm2, %v289_v62, %v255_v48  ;;  %v283_v1 = vsel %vm38_vm2, %v282_v63, %v254_v46 }
 0x15b   :  { %291 = vst [vmem:[#allocation4 + $0x8] sm:$0xff] %v290_v0  ;;  %284 = vst [vmem:[#allocation2 + $0x8] sm:$0xff] %v283_v1 }
 0x15c   :  { %374 = shalt.err (!%p371_p4)
}
 0x15d   :  { %s375_s24 = scalar_lea.hbm %s523_s2, 256 }
 0x15e   :  { %p376_p5 = scmp.ne.s32.totalorder %s523_s2, %s375_s24  ;;  %p379_p6 = scmp.lt.u32.totalorder %s375_s24, %s523_s2 }
 0x160   :  { %p381_p7 = pnand %p379_p6, %p376_p5 }
 0x162   :  { %384 = shalt.err (!%p381_p7)
}
 0x163   :  { %s426_s29 = smov 128   ;;  %s427_s30 = smov 8  }
 0x164   :  { %303 = dma.vmem_to_hbm [thread:$0]  %s298_s18, 256, %s523_s2, [#allocation3], %s426_s29, %s426_s29, %s427_s30  }
 0x165   :  { %s385_s6 = scalar_lea.vmem %s490_s20, 256  ;;  %p390_p9 = scmp.lt.s32.totalorder %s490_s20, %s490_s20 }
 0x166   :  { %p386_p8 = scmp.ne.s32.totalorder %s490_s20, %s385_s6  ;;  %p391_p10 = scmp.lt.s32.totalorder %s385_s6, %s385_s6 }
 0x168   :  { %p392_p11 = por %p391_p10, %p390_p9 }
 0x16a   :  { %p393_p12 = pnand %p392_p11, %p386_p8 }
 0x16c   :  { %396 = shalt.err (!%p393_p12)
}
 0x16d   :  { %s397_s9 = scalar_lea.hbm %s524_s3, 256 }
 0x16e   :  { %p398_p13 = scmp.ne.s32.totalorder %s524_s3, %s397_s9  ;;  %p401_p0 = scmp.lt.u32.totalorder %s397_s9, %s524_s3 }
 0x170   :  { %p403_p1 = pnand %p401_p0, %p398_p13 }
 0x172   :  { %406 = shalt.err (!%p403_p1)
}
 0x173   :  { %315 = dma.vmem_to_hbm [thread:$0]  %s490_s20, 256, %s524_s3, [#allocation5], %s426_s29, %s426_s29, %s427_s30  }
 0x174   :  { %407 = dma.done.wait [#allocation3], 256  }
 0x175   :  { %408 = vsyncadd [#allocation3], 4294967040 }
 0x176   :  { %409 = dma.done.wait [#allocation5], 256  }
 0x177   :  { %410 = vsyncadd [#allocation5], 4294967040 }
 0x178   :  { %322 = vsyncpa [#allocation3], 1 }
 0x179   :  { %323 = vsyncpa [#allocation5], 1 }

</bundles_post_ra>
